<compile_context>
chip_gen: v7x
topology: tpu7x:2x2x1
jax: 0.10.0
libtpu: 0.0.40
codegen_flags: <defaults>
</compile_context>

<pallas_src>
import math

import jax
import jax.numpy as jnp
from jax.experimental import pallas as pl
from jax.experimental.pallas import tpu as pltpu


def _round_up(n, m):
    return ((n + m - 1) // m) * m


# ----------------------------------------------------------------------------
# Kernel
# ----------------------------------------------------------------------------
def _make_denoise_kernel(n_hidden, n_out, *, norm, use_dropout, drop_threshold,
                         keep_scale, half, feat_dim, k0_pad, out_dim, seed_mix):
    """Fused MLP kernel for a fixed static layer structure.

    Args order: (x_ref, t_ref, w0_ref, b0_ref, [w_i, b_i]..., out_ref)
    """

    def kernel(x_ref, t_ref, w0_ref, b0_ref, *rest):
        refs = list(rest)
        out_ref = refs.pop()
        assert len(refs) == 2 * (n_hidden + n_out)

        f32 = jnp.float32
        bf16 = jnp.bfloat16

        x = x_ref[...].astype(f32)                                   # (TB, D)

        if norm:  # F.normalize: x / max(||x||_2, 1e-12) via rsqrt (EUP slot)
            ssq = jnp.sum(x * x, axis=-1, keepdims=True)
            x = x * jax.lax.rsqrt(jnp.maximum(ssq, 1e-24))

        if use_dropout:
            # TODO(synk): PyTorch's dropout RNG stream cannot be reproduced
            # bit-exactly; we use a counter-based splitmix32 hash keyed on
            # (seed, global_row, col) — tiling-invariant, VPU-only ops.
            tb, d = x.shape
            rows = jax.lax.broadcasted_iota(jnp.int32, (tb, d), 0)
            cols = jax.lax.broadcasted_iota(jnp.int32, (tb, d), 1)
            g = (pl.program_id(0) * tb + rows) * d + cols
            v = g.astype(jnp.uint32) + jnp.uint32(seed_mix)
            v = (v ^ (v >> 16)) * jnp.uint32(0x7FEB352D)
            v = (v ^ (v >> 15)) * jnp.uint32(0x846CA68B)
            v = v ^ (v >> 16)
            keep = v >= jnp.uint32(drop_threshold)                   # P(keep)=1-p
            x = jnp.where(keep, x * keep_scale, 0.0)

        # Sinusoidal time embedding built in-kernel (EUP): no HBM stream.
        t = t_ref[...]                                               # (TB, 1) f32
        idx = jax.lax.broadcasted_iota(jnp.int32, (1, half), 1).astype(f32)
        freqs = jnp.exp((-math.log(10000.0) / half) * idx)           # (1, half)
        ang = t * freqs                                              # (TB, half)
        cos_t = jnp.cos(ang).astype(bf16)
        sin_t = jnp.sin(ang).astype(bf16)

        # Single K-dense first matmul on [x | cos | sin | 0-pad]:
        #   tanh(concat([x, emb]) @ W0 + b0) with the emb Linear folded in.
        pieces = [x.astype(bf16), cos_t, sin_t]
        k0 = feat_dim + 2 * half
        if k0_pad > k0:
            pieces.append(jnp.zeros((x.shape[0], k0_pad - k0), bf16))
        feat = jnp.concatenate(pieces, axis=-1)                      # (TB, K0p)
        acc = jnp.dot(feat, w0_ref[...], preferred_element_type=f32) + b0_ref[...]
        h = jnp.tanh(acc.astype(bf16))                               # bf16 tanh

        k = 0
        for _ in range(n_hidden):                                    # in_layers[1:]
            w_ref, b_ref = refs[k], refs[k + 1]
            k += 2
            acc = jnp.dot(h, w_ref[...], preferred_element_type=f32) + b_ref[...]
            h = jnp.tanh(acc.astype(bf16))

        for j in range(n_out):                                       # out_layers
            w_ref, b_ref = refs[k], refs[k + 1]
            k += 2
            acc = jnp.dot(h, w_ref[...], preferred_element_type=f32) + b_ref[...]
            if j != n_out - 1:
                h = jnp.tanh(acc.astype(bf16))

        out_ref[...] = acc[:, :out_dim].astype(out_ref.dtype)

    return kernel


# ----------------------------------------------------------------------------
# Parameters
# ----------------------------------------------------------------------------
def init_params(key, in_dims, out_dims, emb_size):
    """Re-implementation of Denoise.init_weights; weights stored pre-transposed
    as (in_features, out_features)."""
    keys = iter(jax.random.split(key, 64))

    def linear(d_in, d_out):
        std = math.sqrt(2.0 / (d_in + d_out))
        w = std * jax.random.normal(next(keys), (d_in, d_out), jnp.float32)
        b = 0.001 * jax.random.normal(next(keys), (d_out,), jnp.float32)
        return w, b

    emb = linear(emb_size, emb_size)
    in_dims_temp = [in_dims[0] + emb_size] + list(in_dims[1:])
    in_layers = [linear(i, o) for i, o in zip(in_dims_temp[:-1], in_dims_temp[1:])]
    out_layers = [linear(i, o) for i, o in zip(out_dims[:-1], out_dims[1:])]
    return {"emb": emb, "in_layers": in_layers, "out_layers": out_layers}


def pack_params(params, feat_dim, emb_size):
    """One-time pack: fold emb layer into layer 0, stack [Wx0; Wc; Ws] into one
    K-dense first-layer weight, pad feature dims to 128, cast matrices to bf16."""
    half = emb_size // 2
    emb_w, emb_b = params["emb"]                # (E, E), (E,)
    in_layers = params["in_layers"]
    out_layers = params["out_layers"]
    assert len(out_layers) >= 1

    W0, b0 = in_layers[0]                       # (D + E, H0), (H0,)
    Wx0 = W0[:feat_dim]                         # (D, H0)
    We0 = W0[feat_dim:]                         # (E, H0)
    We_fused = emb_w @ We0                      # (E, H0)  exact fold
    b_fused = b0 + emb_b @ We0                  # (H0,)
    Wc = We_fused[:half]                        # pairs with cos(ang)
    Ws = We_fused[half:2 * half]                # pairs with sin(ang)
    # (odd emb_size: the last fused row pairs with the appended zero column of
    #  time_emb and contributes nothing -> dropped.)

    def pad2(a, rows, cols):
        return jnp.pad(a, ((0, rows - a.shape[0]), (0, cols - a.shape[1])))

    bf16 = jnp.bfloat16
    H0 = Wx0.shape[1]
    H0p = _round_up(H0, 128)
    K0 = feat_dim + 2 * half
    K0p = _round_up(K0, 128)

    W0_fused = jnp.concatenate([Wx0, Wc, Ws], axis=0)        # (K0, H0)
    weights = [
        pad2(W0_fused, K0p, H0p).astype(bf16),
        jnp.pad(b_fused, (0, H0p - H0))[None, :],            # f32 (1, H0p)
    ]
    prev_p = H0p
    for (w, b) in list(in_layers[1:]) + list(out_layers):
        dout = w.shape[1]
        doutp = _round_up(dout, 128)
        weights.append(pad2(w, prev_p, doutp).astype(bf16))
        weights.append(jnp.pad(b, (0, doutp - dout))[None, :])
        prev_p = doutp

    return {
        "weights": tuple(weights),
        "half": half,
        "k0_pad": K0p,
        "n_hidden": len(in_layers) - 1,
        "n_out": len(out_layers),
        "out_dim": out_layers[-1][0].shape[1],
        "feat_dim": feat_dim,
    }


def _cost_estimate(B, x_itemsize, weights, n_hidden, n_out, half, out_dim):
    mats = weights[0::2]
    flops = sum(2 * B * int(w.shape[0]) * int(w.shape[1]) for w in mats)
    # cos/sin + tanh on every layer except the last out-layer
    transc = B * 2 * half
    for w in mats[:-1]:
        transc += B * int(w.shape[1])
    weight_bytes = sum(int(a.size) * a.dtype.itemsize for a in weights)
    bytes_accessed = B * (x_itemsize * int(mats[0].shape[0]) + 4 + 4 * out_dim)
    bytes_accessed += weight_bytes
    return pl.CostEstimate(flops=int(flops), transcendentals=int(transc),
                           bytes_accessed=int(bytes_accessed))


def _pick_tb(B, batch_tile):
    """Batch tile: multiple of 8 (or == B), large, and giving >=2 grid steps
    when possible so v7x's two TensorCores are both used."""
    batch_tile = max(8, (int(batch_tile) // 8) * 8)
    if B <= 8:
        return B
    tb = min(batch_tile, _round_up(pl.cdiv(B, 2), 8))
    return B if tb >= B else tb


# ----------------------------------------------------------------------------
# Forward
# ----------------------------------------------------------------------------
def denoise_forward(packed, x, timesteps, *, norm=False, mess_dropout=True,
                    dropout_p=0.5, dropout_seed=0, batch_tile=1024):
    B, D = x.shape
    assert D == packed["feat_dim"]
    half = packed["half"]
    weights = packed["weights"]
    n_hidden = packed["n_hidden"]
    n_out = packed["n_out"]
    out_dim = packed["out_dim"]
    k0_pad = packed["k0_pad"]

    use_dropout = bool(mess_dropout) and float(dropout_p) > 0.0
    assert float(dropout_p) < 1.0, "dropout_p must be < 1"
    drop_threshold = int(round(float(dropout_p) * 2.0 ** 32)) & 0xFFFFFFFF
    keep_scale = 1.0 / (1.0 - float(dropout_p)) if use_dropout else 1.0
    seed_mix = (int(dropout_seed) * 0x9E3779B9 + 0x85EBCA6B) & 0xFFFFFFFF

    TB = _pick_tb(B, batch_tile)
    grid = (pl.cdiv(B, TB),)

    t2d = timesteps.astype(jnp.float32).reshape(B, 1)

    kernel = _make_denoise_kernel(
        n_hidden, n_out, norm=bool(norm), use_dropout=use_dropout,
        drop_threshold=drop_threshold, keep_scale=keep_scale, half=half,
        feat_dim=D, k0_pad=k0_pad, out_dim=out_dim, seed_mix=seed_mix)

    in_specs = [
        pl.BlockSpec((TB, D), lambda i: (i, 0)),    # x rows (pipelined, native dtype)
        pl.BlockSpec((TB, 1), lambda i: (i, 0)),    # timestep column
    ]
    # Weights/biases: constant index map -> fetched once, VMEM-resident.
    in_specs += [pl.BlockSpec(w.shape, lambda i: (0, 0)) for w in weights]
    # Output at the true out_dim (block last dim == full array dim): no padded
    # f32 buffer in HBM and no post-call slice pass.
    out_specs = pl.BlockSpec((TB, out_dim), lambda i: (i, 0))

    # Explicit scoped-VMEM budget: weights (x2 headroom) + double-buffered I/O
    # tiles + activation slack, clamped to [32 MiB, 64 MiB] (valid on v5e..v7x).
    weight_bytes = sum(int(a.size) * a.dtype.itemsize for a in weights)
    max_w = max(int(w.shape[1]) for w in weights[0::2])
    need = (2 * weight_bytes
            + 2 * (TB * D * x.dtype.itemsize + TB * 4 + TB * out_dim * 4)
            + 6 * TB * max(max_w, k0_pad) * 4
            + (4 << 20))
    vmem_limit = int(min(64 << 20, max(32 << 20, need)))

    out = pl.pallas_call(
        kernel,
        out_shape=jax.ShapeDtypeStruct((B, out_dim), jnp.float32),
        grid=grid,
        in_specs=in_specs,
        out_specs=out_specs,
        compiler_params=pltpu.CompilerParams(
            dimension_semantics=("parallel",),
            vmem_limit_bytes=vmem_limit),
        cost_estimate=_cost_estimate(B, x.dtype.itemsize, weights,
                                     n_hidden, n_out, half, out_dim),
    )(x, t2d, *weights)

    return out


# ----------------------------------------------------------------------------
# Pure-JAX reference (f32) for correctness checking
# ----------------------------------------------------------------------------
def reference_forward(params, x, timesteps, emb_size, norm):
    half = emb_size // 2
    freqs = jnp.exp(-math.log(10000.0)
                    * jnp.arange(half, dtype=jnp.float32) / half)
    temp = timesteps.astype(jnp.float32)[:, None] * freqs[None]
    time_emb = jnp.concatenate([jnp.cos(temp), jnp.sin(temp)], axis=-1)
    if emb_size % 2:
        time_emb = jnp.concatenate([time_emb, jnp.zeros_like(time_emb[:, :1])],
                                   axis=-1)
    emb_w, emb_b = params["emb"]
    emb = time_emb @ emb_w + emb_b
    if norm:
        x = x / jnp.maximum(jnp.linalg.norm(x, axis=-1, keepdims=True), 1e-12)
    h = jnp.concatenate([x, emb], axis=-1)
    for (w, b) in params["in_layers"]:
        h = jnp.tanh(h @ w + b)
    outs = params["out_layers"]
    for i, (w, b) in enumerate(outs):
        h = h @ w + b
        if i != len(outs) - 1:
            h = jnp.tanh(h)
    return h


# ----------------------------------------------------------------------------
# Demo / smoke test
# ----------------------------------------------------------------------------
if __name__ == "__main__":
    key = jax.random.PRNGKey(0)
    k_param, k_x, k_t = jax.random.split(key, 3)

    # Small shapes consistent with the module.
    B = 8
    in_dims = [64, 32]      # in_dims[0] = feature dim of x
    out_dims = [32, 64]
    emb_size = 16

    params = init_params(k_param, in_dims, out_dims, emb_size)
    packed = pack_params(params, feat_dim=in_dims[0], emb_size=emb_size)

    x = jax.random.normal(k_x, (B, in_dims[0]), jnp.float32)
    timesteps = jax.random.randint(k_t, (B,), 0, 1000)

    # Path 1: norm + dropout (exercises rsqrt-normalize and in-kernel hash PRNG).
    out1 = denoise_forward(packed, x, timesteps, norm=True,
                           mess_dropout=True, dropout_p=0.5, dropout_seed=123)
    # Path 2: plain eval-style forward (no norm, no dropout) vs. f32 reference.
    out2 = denoise_forward(packed, x, timesteps, norm=False, mess_dropout=False)
    # Path 3: norm, no dropout vs. f32 reference.
    out3 = denoise_forward(packed, x, timesteps, norm=True, mess_dropout=False)

    jax.block_until_ready((out1, out2, out3))

    assert out1.shape == (B, out_dims[-1])
    assert out2.shape == (B, out_dims[-1])
    assert bool(jnp.all(jnp.isfinite(out1)))
    assert bool(jnp.all(jnp.isfinite(out2)))

    ref2 = reference_forward(params, x, timesteps, emb_size, norm=False)
    ref3 = reference_forward(params, x, timesteps, emb_size, norm=True)
    err2 = float(jnp.max(jnp.abs(out2 - ref2)))
    err3 = float(jnp.max(jnp.abs(out3 - ref3)))
    # bf16 weights/activations -> small numerical deviation from f32 reference.
    assert err2 < 0.08, f"eval path mismatch vs reference: {err2}"
    assert err3 < 0.08, f"norm path mismatch vs reference: {err3}"

    print("KERNEL_OK")
</pallas_src>

<mosaic_0001>
module attributes {stable_mosaic.version = 11 : i64} {
  func.func @kernel(%arg0: i32, %arg1: memref<8x64xf32, #tpu.memory_space<vmem>>, %arg2: memref<8x1xf32, #tpu.memory_space<vmem>>, %arg3: memref<128x128xbf16, #tpu.memory_space<vmem>>, %arg4: memref<1x128xf32, #tpu.memory_space<vmem>>, %arg5: memref<128x128xbf16, #tpu.memory_space<vmem>>, %arg6: memref<1x128xf32, #tpu.memory_space<vmem>>, %arg7: memref<8x64xf32, #tpu.memory_space<vmem>>) attributes {dimension_semantics = [#tpu.dimension_semantics<parallel>], iteration_bounds = array<i64: 1>, scalar_prefetch = 0 : i64, scratch_operands = 0 : i64, tpu.core_type = #tpu.core_type<tc>, window_params = [{transform_indices = @transform_0, window_bounds = array<i64: 8, 64>}, {transform_indices = @transform_1, window_bounds = array<i64: 8, 1>}, {pipeline_mode = #tpu.pipeline_mode<synchronous>, transform_indices = @transform_2, window_bounds = array<i64: 128, 128>}, {pipeline_mode = #tpu.pipeline_mode<synchronous>, transform_indices = @transform_3, window_bounds = array<i64: 1, 128>}, {pipeline_mode = #tpu.pipeline_mode<synchronous>, transform_indices = @transform_4, window_bounds = array<i64: 128, 128>}, {pipeline_mode = #tpu.pipeline_mode<synchronous>, transform_indices = @transform_5, window_bounds = array<i64: 1, 128>}, {transform_indices = @transform_6, window_bounds = array<i64: 8, 64>}]} {
    %c0 = arith.constant 0 : index
    %c0_0 = arith.constant 0 : index
    %0 = vector.load %arg1[%c0, %c0_0] : memref<8x64xf32, #tpu.memory_space<vmem>>, vector<8x64xf32>
    %1 = arith.mulf %0, %0 : vector<8x64xf32>
    %cst = arith.constant dense<0.000000e+00> : vector<8xf32>
    %2 = vector.multi_reduction <add>, %1, %cst [1] : vector<8x64xf32> to vector<8xf32>
    %3 = vector.shape_cast %2 : vector<8xf32> to vector<8x1xf32>
    %cst_1 = arith.constant 1.000000e-24 : f32
    %4 = vector.broadcast %cst_1 : f32 to vector<8x1xf32>
    %5 = arith.maximumf %3, %4 : vector<8x1xf32>
    %6 = math.rsqrt %5 : vector<8x1xf32>
    %7 = vector.broadcast %6 : vector<8x1xf32> to vector<8x64xf32>
    %8 = arith.mulf %0, %7 : vector<8x64xf32>
    %9 = tpu.iota {dimensions = array<i32: 0>} : vector<8x64xi32>
    %10 = tpu.iota {dimensions = array<i32: 1>} : vector<8x64xi32>
    %c8_i32 = arith.constant 8 : i32
    %11 = arith.muli %arg0, %c8_i32 : i32
    %12 = vector.broadcast %11 : i32 to vector<8x64xi32>
    %13 = arith.addi %12, %9 : vector<8x64xi32>
    %c64_i32 = arith.constant 64 : i32
    %14 = vector.broadcast %c64_i32 : i32 to vector<8x64xi32>
    %15 = arith.muli %13, %14 : vector<8x64xi32>
    %16 = arith.addi %15, %10 : vector<8x64xi32>
    %c-1970059698_i32 = arith.constant -1970059698 : i32
    %17 = vector.broadcast %c-1970059698_i32 : i32 to vector<8x64xi32>
    %18 = arith.addi %16, %17 : vector<8x64xi32>
    %c16_i32 = arith.constant 16 : i32
    %19 = vector.broadcast %c16_i32 : i32 to vector<8x64xi32>
    %20 = arith.shrui %18, %19 : vector<8x64xi32>
    %21 = arith.xori %18, %20 : vector<8x64xi32>
    %c2146121005_i32 = arith.constant 2146121005 : i32
    %22 = vector.broadcast %c2146121005_i32 : i32 to vector<8x64xi32>
    %23 = arith.muli %21, %22 : vector<8x64xi32>
    %c15_i32 = arith.constant 15 : i32
    %24 = vector.broadcast %c15_i32 : i32 to vector<8x64xi32>
    %25 = arith.shrui %23, %24 : vector<8x64xi32>
    %26 = arith.xori %23, %25 : vector<8x64xi32>
    %c-2073254261_i32 = arith.constant -2073254261 : i32
    %27 = vector.broadcast %c-2073254261_i32 : i32 to vector<8x64xi32>
    %28 = arith.muli %26, %27 : vector<8x64xi32>
    %c16_i32_2 = arith.constant 16 : i32
    %29 = vector.broadcast %c16_i32_2 : i32 to vector<8x64xi32>
    %30 = arith.shrui %28, %29 : vector<8x64xi32>
    %31 = arith.xori %28, %30 : vector<8x64xi32>
    %c-2147483648_i32 = arith.constant -2147483648 : i32
    %32 = vector.broadcast %c-2147483648_i32 : i32 to vector<8x64xi32>
    %33 = arith.cmpi uge, %31, %32 : vector<8x64xi32>
    %cst_3 = arith.constant 2.000000e+00 : f32
    %34 = vector.broadcast %cst_3 : f32 to vector<8x64xf32>
    %35 = arith.mulf %8, %34 : vector<8x64xf32>
    %cst_4 = arith.constant 0.000000e+00 : f32
    %36 = vector.broadcast %cst_4 : f32 to vector<8x64xf32>
    %37 = arith.select %33, %35, %36 : vector<8x64xi1>, vector<8x64xf32>
    %c0_5 = arith.constant 0 : index
    %c0_6 = arith.constant 0 : index
    %38 = vector.load %arg2[%c0_5, %c0_6] : memref<8x1xf32, #tpu.memory_space<vmem>>, vector<8x1xf32>
    %39 = tpu.iota {dimensions = array<i32: 1>} : vector<1x8xi32>
    %40 = arith.sitofp %39 : vector<1x8xi32> to vector<1x8xf32>
    %cst_7 = arith.constant -1.15129256 : f32
    %41 = vector.broadcast %cst_7 : f32 to vector<1x8xf32>
    %42 = arith.mulf %41, %40 : vector<1x8xf32>
    %43 = math.exp %42 : vector<1x8xf32>
    %44 = vector.broadcast %38 : vector<8x1xf32> to vector<8x8xf32>
    %45 = vector.broadcast %43 : vector<1x8xf32> to vector<8x8xf32>
    %46 = arith.mulf %44, %45 : vector<8x8xf32>
    %47 = math.cos %46 : vector<8x8xf32>
    %48 = arith.truncf %47 : vector<8x8xf32> to vector<8x8xbf16>
    %49 = math.sin %46 : vector<8x8xf32>
    %50 = arith.truncf %49 : vector<8x8xf32> to vector<8x8xbf16>
    %51 = arith.truncf %37 : vector<8x64xf32> to vector<8x64xbf16>
    %cst_8 = arith.constant 0.000000e+00 : bf16
    %52 = vector.broadcast %cst_8 : bf16 to vector<8x48xbf16>
    %53 = tpu.concatenate %51, %48, %50, %52 in 1 : vector<8x64xbf16>, vector<8x8xbf16>, vector<8x8xbf16>, vector<8x48xbf16> -> vector<8x128xbf16>
    %c0_9 = arith.constant 0 : index
    %c0_10 = arith.constant 0 : index
    %54 = vector.load %arg3[%c0_9, %c0_10] : memref<128x128xbf16, #tpu.memory_space<vmem>>, vector<128x128xbf16>
    %cst_11 = arith.constant dense<0.000000e+00> : vector<8x128xf32>
    %55 = tpu.matmul %53, %54, %cst_11 {dimension_numbers = #tpu.dot_dimension_numbers<[1], [0], [0], [1], [0, 0, 1, 1], [], []>} : vector<8x128xbf16>, vector<128x128xbf16>, vector<8x128xf32> -> vector<8x128xf32>
    %c0_12 = arith.constant 0 : index
    %c0_13 = arith.constant 0 : index
    %56 = vector.load %arg4[%c0_12, %c0_13] : memref<1x128xf32, #tpu.memory_space<vmem>>, vector<1x128xf32>
    %57 = vector.broadcast %56 : vector<1x128xf32> to vector<8x128xf32>
    %58 = arith.addf %55, %57 : vector<8x128xf32>
    %59 = arith.truncf %58 : vector<8x128xf32> to vector<8x128xbf16>
    %60 = math.tanh %59 : vector<8x128xbf16>
    %c0_14 = arith.constant 0 : index
    %c0_15 = arith.constant 0 : index
    %61 = vector.load %arg5[%c0_14, %c0_15] : memref<128x128xbf16, #tpu.memory_space<vmem>>, vector<128x128xbf16>
    %cst_16 = arith.constant dense<0.000000e+00> : vector<8x128xf32>
    %62 = tpu.matmul %60, %61, %cst_16 {dimension_numbers = #tpu.dot_dimension_numbers<[1], [0], [0], [1], [0, 0, 1, 1], [], []>} : vector<8x128xbf16>, vector<128x128xbf16>, vector<8x128xf32> -> vector<8x128xf32>
    %c0_17 = arith.constant 0 : index
    %c0_18 = arith.constant 0 : index
    %63 = vector.load %arg6[%c0_17, %c0_18] : memref<1x128xf32, #tpu.memory_space<vmem>>, vector<1x128xf32>
    %64 = vector.broadcast %63 : vector<1x128xf32> to vector<8x128xf32>
    %65 = arith.addf %62, %64 : vector<8x128xf32>
    %66 = vector.extract_strided_slice %65 {offsets = [0, 0], sizes = [8, 64], strides = [1, 1]} : vector<8x128xf32> to vector<8x64xf32>
    %c0_19 = arith.constant 0 : index
    %c0_20 = arith.constant 0 : index
    %67 = vector.load %arg7[%c0_19, %c0_20] : memref<8x64xf32, #tpu.memory_space<vmem>>, vector<8x64xf32>
    tpu.vector_store %arg7[%c0_19, %c0_20], %66 {strides = array<i32>} : memref<8x64xf32, #tpu.memory_space<vmem>>, vector<8x64xf32>,
    return
  }
  func.func @transform_0(%arg0: i32) -> (i32, i32) {
    %c0_i32 = arith.constant 0 : i32
    %c0_i32_0 = arith.constant 0 : i32
    return %arg0, %c0_i32 : i32, i32
  }
  func.func @transform_1(%arg0: i32) -> (i32, i32) {
    %c0_i32 = arith.constant 0 : i32
    %c0_i32_0 = arith.constant 0 : i32
    return %arg0, %c0_i32 : i32, i32
  }
  func.func @transform_2(%arg0: i32) -> (i32, i32) {
    %c0_i32 = arith.constant 0 : i32
    %c0_i32_0 = arith.constant 0 : i32
    %c0_i32_1 = arith.constant 0 : i32
    return %c0_i32, %c0_i32_0 : i32, i32
  }
  func.func @transform_3(%arg0: i32) -> (i32, i32) {
    %c0_i32 = arith.constant 0 : i32
    %c0_i32_0 = arith.constant 0 : i32
    %c0_i32_1 = arith.constant 0 : i32
    return %c0_i32, %c0_i32_0 : i32, i32
  }
  func.func @transform_4(%arg0: i32) -> (i32, i32) {
    %c0_i32 = arith.constant 0 : i32
    %c0_i32_0 = arith.constant 0 : i32
    %c0_i32_1 = arith.constant 0 : i32
    return %c0_i32, %c0_i32_0 : i32, i32
  }
  func.func @transform_5(%arg0: i32) -> (i32, i32) {
    %c0_i32 = arith.constant 0 : i32
    %c0_i32_0 = arith.constant 0 : i32
    %c0_i32_1 = arith.constant 0 : i32
    return %c0_i32, %c0_i32_0 : i32, i32
  }
  func.func @transform_6(%arg0: i32) -> (i32, i32) {
    %c0_i32 = arith.constant 0 : i32
    %c0_i32_0 = arith.constant 0 : i32
    return %arg0, %c0_i32 : i32, i32
  }
}

</mosaic_0001>

<bundles_post_ra>
// kernel: tpu_custom_call.1
= control target key start
LH: loop header
LB: loop body
LE: loop exit
PB: predicated region body
PF: predicated region fallthrough
CT: control target
= control target key end

     0   :  { %11 = vsyncpa [#allocation3], 0  ;;  %s920_s0 = inlined_call_operand.vmem [shape: f32[8,64], index: 0, kind: input, shape index: {}]   ;;  %s921_s1 = inlined_call_operand.vmem [shape: f32[8,1], index: 1, kind: input, shape index: {}]   ;;  %s922_s2 = inlined_call_operand.hbm [shape: bf16[128,128], index: 2, kind: input, shape index: {}]   ;;  %s923_s3 = inlined_call_operand.vmem [shape: f32[1,128], index: 3, kind: input, shape index: {}]   ;;  %s924_s4 = inlined_call_operand.hbm [shape: bf16[128,128], index: 4, kind: input, shape index: {}]   ;;  %s925_s5 = inlined_call_operand.vmem [shape: f32[1,128], index: 5, kind: input, shape index: {}]   ;;  %s926_s6 = inlined_call_operand.hbm [shape: f32[8,64], index: 6, kind: output, shape index: {}]  }
   0x1   :  { %12 = vsyncpa [#allocation6], 0 }
   0x2   :  { %13 = vsyncpa [#allocation4], 0  ;;  %s764_s21 = smov [#allocation2]   ;;  %s692_s25 = scalar_lea.hbm %s922_s2, 1024 }
   0x3   :  { %s23_s22 = sshll.u32 %s764_s21, 4  ;;  %p693_p0 = scmp.ne.s32.totalorder %s922_s2, %s692_s25  ;;  %s24_s22 = int_to_ptr.vmem [resolvable:$true] %s23_s22 }
   0x4   :  { %p696_p1 = scmp.lt.u32.totalorder %s692_s25, %s922_s2 }
   0x6   :  { %p698_p2 = pnand %p696_p1, %p693_p0 }
   0x8   :  { %701 = shalt.err (!%p698_p2)
}
   0x9   :  { %s702_s30 = scalar_lea.vmem %s24_s22, 1024  ;;  %p707_p4 = scmp.lt.s32.totalorder %s24_s22, %s24_s22 }
   0xa   :  { %p703_p3 = scmp.ne.s32.totalorder %s24_s22, %s702_s30  ;;  %p708_p5 = scmp.lt.s32.totalorder %s702_s30, %s702_s30 }
   0xc   :  { %p709_p6 = por %p708_p5, %p707_p4 }
   0xe   :  { %p710_p7 = pnand %p709_p6, %p703_p3 }
  0x10   :  { %713 = shalt.err (!%p710_p7)
}
  0x11   :  { %s765_s7 = smov 64   ;;  %s766_s8 = smov 4  }
  0x12   :  { %29 = dma.hbm_to_vmem [thread:$0]  %s922_s2, 1024, %s24_s22, [#allocation3], %s765_s7, %s765_s7, %s766_s8  }
  0x13   :  { %s767_s11 = smov [#allocation5]   ;;  %s714_s15 = scalar_lea.hbm %s924_s4, 1024 }
  0x14   :  { %s37_s12 = sshll.u32 %s767_s11, 4  ;;  %p715_p8 = scmp.ne.s32.totalorder %s924_s4, %s714_s15  ;;  %s38_s12 = int_to_ptr.vmem [resolvable:$true] %s37_s12 }
  0x15   :  { %p718_p9 = scmp.lt.u32.totalorder %s714_s15, %s924_s4 }
  0x17   :  { %p720_p10 = pnand %p718_p9, %p715_p8 }
  0x19   :  { %723 = shalt.err (!%p720_p10)
}
  0x1a   :  { %s724_s20 = scalar_lea.vmem %s38_s12, 1024  ;;  %p729_p12 = scmp.lt.s32.totalorder %s38_s12, %s38_s12 }
  0x1b   :  { %p725_p11 = scmp.ne.s32.totalorder %s38_s12, %s724_s20  ;;  %p730_p13 = scmp.lt.s32.totalorder %s724_s20, %s724_s20 }
  0x1d   :  { %p731_p0 = por %p730_p13, %p729_p12 }
  0x1f   :  { %p732_p1 = pnand %p731_p0, %p725_p11 }
  0x21   :  { %735 = shalt.err (!%p732_p1)
}
  0x22   :  { %43 = dma.hbm_to_vmem [thread:$0]  %s924_s4, 1024, %s38_s12, [#allocation6], %s765_s7, %s765_s7, %s766_s8  }
  0x23   :  { %758 = dma.done.wait [#allocation3], 1024  }
  0x24   :  { %759 = vsyncadd [#allocation3], 4294966272 }
  0x25   :  { %760 = dma.done.wait [#allocation6], 1024  }
  0x26   :  { %761 = vsyncadd [#allocation6], 4294966272  ;;  %v768_v0 = vmov 0   ;;  %v83_v1 = vld [vmem:[%s921_s1] sm:$0xff]  ;;  %vm55_vm0 = vcmask 523264   ;;  %v769_v6 = vmov 0.0   ;;  %v62_v8 = vlaneseq }
  0x27   :  { %665 = vset.pattern.permute.xlu0 %v768_v0  ;;  %v848_v2 = vld [vmem:[%s920_s0] sm:$0xff]  ;;  %606 = vmatprep.subr.bf16.mxu0 %v769_v6  ;;  %v667_v7 = vld [vmem:[#allocation2 + $0x8] sm:$0xff]   ;;  %v668_v9 = vld [vmem:[#allocation2 + $0x10] sm:$0xff]   ;;  %v770_v32 = vmov 2102212464   ;;  %vm776_vm10 = vmmov 0  }
  0x28   :  { %90 = vperm.xlu0 %665, %v83_v1   ;;  %v54_v3 = vmul.f32 %v848_v2, %v848_v2  ;;  %v666_v5 = vld [vmem:[#allocation2] sm:$0xff]   ;;  %626 = vmatprep.subr.bf16.mxu1 %v769_v6  ;;  %v858_v10 = vand.u32 127, %v62_v8  ;;  %v669_v11 = vld [vmem:[#allocation2 + $0x18] sm:$0xff]   ;;  %v671_v15 = vld [vmem:[#allocation2 + $0x28] sm:$0xff]   ;;  %v771_v34 = vmov 920167782  }
  0x29   :  { %607 = vmatpush3.bf16.msra.mxu0 %v666_v5  ;;  %v670_v13 = vld [vmem:[#allocation2 + $0x20] sm:$0xff]   ;;  %v672_v17 = vld [vmem:[#allocation2 + $0x30] sm:$0xff]   ;;  %v772_v38 = vmov 1326507024   ;;  %v773_v40 = vmov 683565275   ;;  %622 = vmatprep.mubr.msk.bf16.mxu0 %vm776_vm10, %v769_v6 }
  0x2a   :  { %v56_v4 = vsel %vm55_vm0, %v54_v3, 0.0  ;;  %608 = vmatprep.subr.bf16.mxu0 %v769_v6  ;;  %v84_v12 = vcvt.s32.f32 %v858_v10  ;;  %v774_v42 = vmov 2475754826   ;;  %v775_v45 = vmov 2131351028   ;;  %642 = vmatprep.mubr.msk.bf16.mxu1 %vm776_vm10, %v769_v6  ;;  %s777_s0 = smov 72  }
  0x2b   :  { %s778_s28 = smov [#allocation7]  }
  0x2c   :  { %v85_v14 = vmul.f32 -1.1512926, %v84_v12  ;;  %s551_s29 = sshll.u32 %s778_s28, 4  ;;  %s552_s29 = int_to_ptr.vmem [resolvable:$true] %s551_s29 }
  0x2d   :  { %609 = vmatpush3.bf16.msra.mxu0 %v667_v7  ;;  %p741_p3 = scmp.lt.s32.totalorder %s552_s29, %s552_s29 }
  0x2e   :  { %610 = vmatprep.subr.bf16.mxu0 %v769_v6  ;;  %v86_v16 = vmul.f32 1.442695, %v85_v14 }
  0x30   :  { %682 = vpow2.f32 %v86_v16 }
  0x31   :  { %611 = vmatpush3.bf16.msra.mxu0 %v668_v9 }
  0x32   :  { %612 = vmatprep.subr.bf16.mxu0 %v769_v6 }
  0x35   :  { %613 = vmatpush3.bf16.msra.mxu0 %v669_v11 }
  0x36   :  { %614 = vmatprep.subr.bf16.mxu0 %v769_v6 }
  0x39   :  { %615 = vmatpush3.bf16.msra.mxu0 %v670_v13 }
  0x3a   :  { %616 = vmatprep.subr.bf16.mxu0 %v769_v6  ;;  %v683_v18 = vpop.eup %682 }
  0x3d   :  { %617 = vmatpush3.bf16.msra.mxu0 %v671_v15 }
  0x3e   :  { %618 = vmatprep.subr.bf16.mxu0 %v769_v6 }
  0x41   :  { %619 = vmatpush3.bf16.msra.mxu0 %v672_v17 }
  0x42   :  { %620 = vmatprep.subr.bf16.mxu0 %v769_v6 }
  0x47   :  { %57 = vadd.xlane.f32.xlu0 %v56_v4 }
  0xa7   :  { %v91_v19 = vpop.permute.xlu0 %90 }
  0xa8   :  { %v866_v20 = vmul.f32 %v683_v18, %v91_v19 }
  0xaa   :  { %v97_v21 = vand.u32 2139095040, %v866_v20  ;;  %v94_v22 = vand.u32 2147483647, %v866_v20  ;;  %vm96_vm8 = vcmp.lt.s32.totalorder %v866_v20, 0 }
  0xac   :  { %v98_v23 = vshrl.u32 %v97_v21, 23  ;;  %v101_v25 = vand.u32 8388607, %v94_v22  ;;  %vm95_vm9 = vcmp.le.f32.partialorder %v94_v22, 0.7853982 }
  0xae   :  { %v561_v24 = vadd.s32 4294967169, %v98_v23  ;;  %v102_v28 = vor.u32 8388608, %v101_v25 }
  0xb0   :  { %v104_v26 = vadd.s32 1, %v561_v24  ;;  %v142_v36 = vshll.u32 %v102_v28, 8 }
  0xb2   :  { %vm105_vm1 = vcmp.gt.s32.totalorder %v104_v26, 0 }
  0xb3   :  { %v106_v27 = vsel %vm105_vm1, %v104_v26, 0 }
  0xb4   :  { %v108_v29 = vand.u32 31, %v106_v27  ;;  %v107_v30 = vshrl.u32 %v106_v27, 5 }
  0xb6   :  { %v109_v31 = vsub.s32 32, %v108_v29  ;;  %v120_v33 = vshll.u32 %v770_v32, %v108_v29  ;;  %v123_v35 = vshll.u32 %v771_v34, %v108_v29  ;;  %v111_v41 = vshll.u32 %v773_v40, %v108_v29 }
  0xb7   :  { %v114_v44 = vshll.u32 %v774_v42, %v108_v29  ;;  %v117_v47 = vshll.u32 %v775_v45, %v108_v29  ;;  %vm129_vm2 = vcmp.lt.s32.totalorder %v107_v30, 4  ;;  %vm126_vm3 = vcmp.lt.s32.totalorder %v107_v30, 1 }
  0xb8   :  { %v121_v37 = vshrl.u32 %v771_v34, %v109_v31  ;;  %v124_v39 = vshrl.u32 %v772_v38, %v109_v31  ;;  %v112_v43 = vshrl.u32 %v774_v42, %v109_v31  ;;  %v115_v46 = vshrl.u32 %v775_v45, %v109_v31  ;;  %v673_v45 = vld [vmem:[#allocation2 + $0x38] sm:$0xff]  }
  0xb9   :  { %v118_v48 = vshrl.u32 %v770_v32, %v109_v31  ;;  %v110_v52 = vshrl.u32 %v773_v40, %v109_v31  ;;  %vm127_vm4 = vcmp.lt.s32.totalorder %v107_v30, 2  ;;  %vm128_vm5 = vcmp.lt.s32.totalorder %v107_v30, 3  ;;  %621 = vmatpush3.bf16.msra.mxu0 %v673_v45 }
  0xba   :  { %v122_v49 = vor.u32 %v121_v37, %v120_v33  ;;  %v125_v50 = vor.u32 %v124_v39, %v123_v35  ;;  %v113_v51 = vor.u32 %v112_v43, %v111_v41  ;;  %v116_v53 = vor.u32 %v115_v46, %v114_v44 }
  0xbb   :  { %v119_v54 = vor.u32 %v118_v48, %v117_v47 }
  0xbc   :  { %v135_v55 = vsel %vm129_vm2, %v122_v49, 920167782  ;;  %v139_v56 = vsel %vm129_vm2, %v125_v50, 1326507024  ;;  %v134_v58 = vsel %vm126_vm3, %v113_v51, %v116_v53  ;;  %v130_v61 = vsel %vm126_vm3, %v110_v52, %v113_v51  ;;  %v674_v51 = vld [vmem:[#allocation5] sm:$0xff]  }
  0xbd   :  { %v131_v57 = vsel %vm129_vm2, %v119_v54, 2102212464  ;;  %v136_v59 = vsel %vm128_vm5, %v119_v54, %v135_v55  ;;  %v138_v60 = vsel %vm126_vm3, %v116_v53, %v119_v54  ;;  %v140_v0 = vsel %vm128_vm5, %v122_v49, %v139_v56  ;;  %627 = vmatpush3.bf16.msra.mxu1 %v674_v51  ;;  %v675_v54 = vld [vmem:[#allocation5 + $0x8] sm:$0xff]  }
  0xbe   :  { %v132_v62 = vsel %vm128_vm5, %v116_v53, %v131_v57  ;;  %v137_v63 = vsel %vm127_vm4, %v134_v58, %v136_v59  ;;  %v141_v1 = vsel %vm127_vm4, %v138_v60, %v140_v0  ;;  %628 = vmatprep.subr.bf16.mxu1 %v769_v6  ;;  %vm186_vm2 = vweird.f32 %v866_v20  ;;  %v677_v0 = vld [vmem:[#allocation5 + $0x18] sm:$0xff]  }
  0xbf   :  { %v872_v3 = vmul.u32.u64.low %v142_v36, %v137_v63  ;;  %v873_v4 = vmul.u32.u64.high %v142_v36, %v137_v63, %v872_v3  ;;  %v875_v5 = vmul.u32.u64.low %v142_v36, %v141_v1  ;;  %v876_v7 = vmul.u32.u64.high %v142_v36, %v141_v1, %v875_v5 }
  0xc0   :  { %v133_v9 = vsel %vm127_vm4, %v130_v61, %v132_v62  ;;  %v676_v61 = vld [vmem:[#allocation5 + $0x10] sm:$0xff]   ;;  %vm313_vm4 = vcmask 588800   ;;  %vm316_vm5 = vcmask 654336  }
  0xc1   :  { %v152_v11 = vadd.s32 1, %v873_v4  ;;  %v149_v12 = vmul.u32 %v142_v36, %v133_v9  ;;  %vm151_vm6 = vc.u32 %v876_v7, %v872_v3  ;;  %v150_v26 = vadd.s32 %v872_v3, %v876_v7  ;;  %629 = vmatpush3.bf16.msra.mxu1 %v675_v54 }
  0xc2   :  { %630 = vmatprep.subr.bf16.mxu1 %v769_v6 }
  0xc3   :  { %v153_v13 = vsel %vm151_vm6, %v152_v11, %v873_v4 }
  0xc4   :  { %v154_v14 = vadd.s32 %v153_v13, %v149_v12 }
  0xc5   :  { %631 = vmatpush3.bf16.msra.mxu1 %v676_v61 }
  0xc6   :  { %v155_v15 = vadd.s32 536870912, %v154_v14  ;;  %632 = vmatprep.subr.bf16.mxu1 %v769_v6 }
  0xc8   :  { %v156_v16 = vshrl.u32 %v155_v15, 30 }
  0xc9   :  { %633 = vmatpush3.bf16.msra.mxu1 %v677_v0 }
  0xca   :  { %v157_v17 = vshll.u32 %v156_v16, 30  ;;  %v180_v38 = vsub.s32 4, %v156_v16  ;;  %634 = vmatprep.subr.bf16.mxu1 %v769_v6 }
  0xcc   :  { %v158_v18 = vsub.s32 %v154_v14, %v157_v17  ;;  %v181_v41 = vsel %vm96_vm8, %v180_v38, %v156_v16  ;;  %v579_v38 = vld [vmem:[%s925_s5] ss:$0 sm:$0xff] }
  0xcd   :  { %v183_v43 = vsel %vm95_vm9, 0, %v181_v41 }
  0xce   :  { %v160_v19 = vsub.s32 0, %v158_v18  ;;  %v291_v44 = vadd.s32 3, %v183_v43  ;;  %v187_v46 = vand.u32 3, %v183_v43 }
  0xd0   :  { %v562_v21 = vmin.u32 %v160_v19, %v158_v18  ;;  %v292_v47 = vand.u32 3, %v291_v44  ;;  %vm192_vm11 = vcmp.eq.s32.totalorder %v187_v46, 2  ;;  %vm189_vm13 = vcmp.eq.s32.totalorder %v187_v46, 0 }
  0xd1   :  { %vm188_vm15 = vcmp.lt.s32.totalorder %v187_v46, 2 }
  0xd2   :  { %v162_v23 = vclz %v562_v21  ;;  %vm297_vm12 = vcmp.eq.s32.totalorder %v292_v47, 2  ;;  %vm294_vm14 = vcmp.eq.s32.totalorder %v292_v47, 0  ;;  %vm293_vm1 = vcmp.lt.s32.totalorder %v292_v47, 2 }
  0xd4   :  { %v563_v24 = vadd.s32 4294967294, %v162_v23  ;;  %v58_v9 = vpop.xlane.xlu0 %57 }
  0xd5   :  { %v59_v12 = vmax.f32 %v58_v9, 1e-24 }
  0xd6   :  { %vm564_vm7 = vcmp.lt.s32.totalorder %v563_v24, 0 }
  0xd7   :  { %v165_v25 = vsel %vm564_vm7, 0, %v563_v24 }
  0xd8   :  { %v166_v27 = vsub.s32 32, %v165_v25  ;;  %v170_v28 = vsub.s32 4294967266, %v165_v25  ;;  %v167_v29 = vshll.u32 %v158_v18, %v165_v25 }
  0xda   :  { %v168_v30 = vshrl.u32 %v150_v26, %v166_v27  ;;  %v171_v31 = vadd.s32 127, %v170_v28  ;;  %v678_v27 = vld [vmem:[#allocation5 + $0x20] sm:$0xff]   ;;  %v679_v28 = vld [vmem:[#allocation5 + $0x28] sm:$0xff]  }
  0xdb   :  { %635 = vmatpush3.bf16.msra.mxu1 %v678_v27 }
  0xdc   :  { %v169_v32 = vor.u32 %v168_v30, %v167_v29  ;;  %v172_v33 = vshll.u32 %v171_v31, 23  ;;  %636 = vmatprep.subr.bf16.mxu1 %v769_v6  ;;  %v681_v29 = vld [vmem:[#allocation5 + $0x38] sm:$0xff]   ;;  %v569_v30 = vld [vmem:[%s923_s3] ss:$0 sm:$0xff]  ;;  %s736_s3 = scalar_lea.vmem %s552_s29, 128 }
  0xdd   :  { %p737_p2 = scmp.ne.s32.totalorder %s552_s29, %s736_s3  ;;  %p742_p4 = scmp.lt.s32.totalorder %s736_s3, %s736_s3 }
  0xde   :  { %v173_v34 = vor.u32 4788187, %v172_v33  ;;  %v176_v36 = vcvt.s32.f32 %v169_v32 }
  0xdf   :  { %637 = vmatpush3.bf16.msra.mxu1 %v679_v28  ;;  %p743_p5 = por %p742_p4, %p741_p3 }
  0xe0   :  { %v174_v35 = vand.u32 2147483647, %v173_v34  ;;  %638 = vmatprep.subr.bf16.mxu1 %v769_v6 }
  0xe1   :  { %p744_p6 = pnand %p743_p5, %p737_p2 }
  0xe2   :  { %v177_v37 = vmul.f32 %v176_v36, %v174_v35 }
  0xe4   :  { %v178_v39 = vxor.u32 2147483648, %v177_v37 }
  0xe6   :  { %v179_v40 = vsel %vm96_vm8, %v178_v39, %v177_v37 }
  0xe7   :  { %v182_v42 = vsel %vm95_vm9, %v866_v20, %v179_v40  ;;  %v63_v20 = vshrl.u32 %v62_v8, 7 }
  0xe8   :  { %684 = vcosq.f32 %v182_v42 }
  0xe9   :  { %686 = vsinq.f32 %v182_v42  ;;  %v69_v1 = vmul.u32 64, %v63_v20 }
  0xea   :  { %688 = vrsqrt.f32 %v59_v12 }
  0xeb   :  { %v70_v3 = vadd.s32 %v69_v1, %v858_v10 }
  0xed   :  { %v71_v4 = vadd.s32 2324907598, %v70_v3 }
  0xef   :  { %v72_v5 = vshrl.u32 %v71_v4, 16 }
  0xf1   :  { %v73_v7 = vxor.u32 %v72_v5, %v71_v4 }
  0xf2   :  { %v685_v48 = vpop.eup %684 }
  0xf3   :  { %v687_v49 = vpop.eup %686  ;;  %v193_v50 = vxor.u32 2147483648, %v685_v48  ;;  %v74_v11 = vmul.u32 2146121005, %v73_v7 }
  0xf4   :  { %v190_v22 = vxor.u32 2147483648, %v687_v49  ;;  %v689_v16 = vpop.eup %688 }
  0xf5   :  { %v194_v52 = vsel %vm192_vm11, %v193_v50, %v687_v49  ;;  %v299_v53 = vsel %vm297_vm12, %v193_v50, %v687_v49  ;;  %v75_v13 = vshrl.u32 %v74_v11, 15  ;;  %v61_v18 = vmul.f32 %v689_v16, %v848_v2  ;;  %v680_v2 = vld [vmem:[#allocation5 + $0x30] sm:$0xff]  }
  0xf6   :  { %v191_v55 = vsel %vm189_vm13, %v685_v48, %v190_v22  ;;  %v296_v56 = vsel %vm294_vm14, %v685_v48, %v190_v22  ;;  %639 = vmatpush3.bf16.msra.mxu1 %v680_v2 }
  0xf7   :  { %v195_v57 = vsel %vm188_vm15, %v191_v55, %v194_v52  ;;  %v300_v58 = vsel %vm293_vm1, %v296_v56, %v299_v53  ;;  %v76_v14 = vxor.u32 %v75_v13, %v74_v11  ;;  %v81_v21 = vmul.f32 2.0, %v61_v18  ;;  %640 = vmatprep.subr.bf16.mxu1 %v769_v6 }
  0xf8   :  { %v196_v59 = vsel %vm186_vm2, nan, %v195_v57  ;;  %v301_v62 = vsel %vm186_vm2, nan, %v300_v58 }
  0xf9   :  { %v197_v60 = vpack.c.bf16 %v196_v59, %v196_v59  ;;  %v302_v63 = vpack.c.bf16 %v301_v62, %v301_v62  ;;  %v77_v15 = vmul.u32 2221713035, %v76_v14 }
  0xfa   :  { %641 = vmatpush3.bf16.msra.mxu1 %v681_v29 }
  0xfb   :  { %305 = vrot.lane.b32.xlu1 %v197_v60, %s765_s7  ;;  %v78_v17 = vshrl.u32 %v77_v15, 16 }
  0xfd   :  { %v79_v19 = vxor.u32 %v78_v17, %v77_v15 }
  0xff   :  { %308 = vrot.lane.b32.xlu1 %v302_v63, %s777_s0  ;;  %vm80_vm3 = vcmp.ge.u32.totalorder %v79_v19, 2147483648 }
 0x100   :  { %v82_v8 = vsel %vm80_vm3, %v81_v21, 0.0 }
 0x101   :  { %v303_v10 = vpack.c.bf16 %v82_v8, %v82_v8 }
 0x16d   :  { %v306_v23 = vpop.permute.xlu1 %305 }
 0x16e   :  { %v312_v24 = vsel %vm55_vm0, %v303_v10, %v306_v23 }
 0x171   :  { %v309_v25 = vpop.permute.xlu1 %308 }
 0x172   :  { %v315_v26 = vsel %vm313_vm4, %v312_v24, %v309_v25 }
 0x173   :  { %623 = vmatmul.mubr.msk.bf16.vlgmr.msra.gmra.mrb[0].mxu0 %vm316_vm5, %v315_v26 }
 0x246   :  { %v425_v31 = vpop.f32.mrb[0].mxu0 }
 0x247   :  { %v426_v32 = vadd.f32 %v569_v30, %v425_v31  ;;  %v624_v33 = vpop.f32.mrb[1].mxu0 }
 0x248   :  { %v428_v34 = vpop.f32.mrb[2].mxu0 }
 0x249   :  { %v431_v35 = vpack.c.bf16 %v426_v32, %v426_v32  ;;  %v625_v36 = vpop.f32.mrb[3].mxu0 }
 0x24b   :  { %690 = vtanh.bf16 %v431_v35 }
 0x256   :  { %v691_v37 = vpop.eup %690 }
 0x257   :  { %643 = vmatmul.mubr.bf16.vlgmr.msra.gmra.mrb[0].mxu1 %v691_v37 }
 0x32a   :  { %v538_v6 = vpop.f32.mrb[0].mxu1 }
 0x32b   :  { %v539_v39 = vadd.f32 %v579_v38, %v538_v6  ;;  %v644_v40 = vpop.f32.mrb[1].mxu1 }
 0x32c   :  { %v541_v41 = vpop.f32.mrb[2].mxu1 }
 0x32d   :  { %544 = vst.msk [vmem:[#allocation7] sm:$0xff] %vm55_vm0, %v539_v39  ;;  %v645_v42 = vpop.f32.mrb[3].mxu1 }
 0x32e   :  { %747 = shalt.err (!%p744_p6)
}
 0x32f   :  { %s748_s5 = scalar_lea.hbm %s926_s6, 128 }
 0x330   :  { %p749_p7 = scmp.ne.s32.totalorder %s926_s6, %s748_s5  ;;  %p752_p8 = scmp.lt.u32.totalorder %s748_s5, %s926_s6 }
 0x332   :  { %p754_p9 = pnand %p752_p8, %p749_p7 }
 0x334   :  { %757 = shalt.err (!%p754_p9)
}
 0x335   :  { %554 = dma.vmem_to_hbm [thread:$0]  %s552_s29, 128, %s926_s6, [#allocation4]  }
 0x336   :  { %762 = dma.done.wait [#allocation4], 128  }
 0x337   :  { %763 = vsyncadd [#allocation4], 4294967168 }
 0x338   :  { %558 = vsyncpa [#allocation3], 1 }
 0x339   :  { %559 = vsyncpa [#allocation6], 1 }
 0x33a   :  { %560 = vsyncpa [#allocation4], 1 }

</bundles_post_ra>
